<compile_context>
chip_gen: v7x
topology: tpu7x:2x2x1
jax: 0.10.0
libtpu: 0.0.40
codegen_flags: <defaults>
</compile_context>

<pallas_src>
import functools

import jax
import jax.numpy as jnp
from jax.experimental import pallas as pl
from jax.experimental.pallas import tpu as pltpu


def _round_up(x: int, m: int) -> int:
    return ((x + m - 1) // m) * m


def _lm_head_kernel(*refs, eps: float, add_bias: bool):
    """refs = (x, w1, [b1], gamma, beta, wd, bd, out, h_scratch)."""
    if add_bias:
        x_ref, w1_ref, b1_ref, g_ref, beta_ref, wd_ref, bd_ref, o_ref, h_ref = refs
    else:
        x_ref, w1_ref, g_ref, beta_ref, wd_ref, bd_ref, o_ref, h_ref = refs
        b1_ref = None

    # dense -> ReLU -> LayerNorm: compute once per token tile (vocab axis is the
    # innermost / 'arbitrary' grid axis, so the scratch stays valid across it).
    @pl.when(pl.program_id(1) == 0)
    def _():
        # native-dtype operands, f32 accumulation on the MXU
        h = jnp.dot(x_ref[...], w1_ref[...],
                    preferred_element_type=jnp.float32)            # [tm, H] f32
        if add_bias:
            h = h + b1_ref[...].astype(jnp.float32)
        h = jnp.maximum(h, 0.0)
        mu = jnp.mean(h, axis=-1, keepdims=True)
        var = jnp.mean((h - mu) * (h - mu), axis=-1, keepdims=True)
        h = (h - mu) * jax.lax.rsqrt(var + eps)
        h = h * g_ref[...].astype(jnp.float32) + beta_ref[...].astype(jnp.float32)
        h_ref[...] = h.astype(h_ref.dtype)

    # tied decoder for this vocab tile
    logits = jnp.dot(h_ref[...], wd_ref[...],
                     preferred_element_type=jnp.float32)            # [tm, tn] f32
    logits = logits + bd_ref[...].astype(jnp.float32)
    o_ref[...] = logits.astype(o_ref.dtype)


def multi_source_lm_head(features, dense_w, dense_b, ln_gamma, ln_beta,
                         emb_weight, dec_b, *, eps: float = 1e-5,
                         add_bias: bool = True, tm: int = 256, tn: int = 512,
                         vmem_limit_bytes: int = 64 * 1024 * 1024):
    """
    features:   [B, S, H]
    dense_w:    [H, H]   (PyTorch nn.Linear weight, [out, in])
    dense_b:    [H]
    ln_gamma:   [H]
    ln_beta:    [H]
    emb_weight: [V, H]   (embedding table; decoder weight is tied to it)
    dec_b:      [V]
    returns     [B, S, V]
    """
    B, S, H = features.shape
    V = emb_weight.shape[0]
    N = B * S

    # Token tile (sublane axis): multiple of 16 (safe for bf16 packing), capped at N.
    tm = _round_up(min(tm, _round_up(N, 16)), 16)
    Np = _round_up(N, tm)
    # Vocab tile (lane axis): multiple of 128 -> lane-dense, unmasked output stores.
    tn = _round_up(min(tn, _round_up(V, 128)), 128)
    Vp = _round_up(V, tn)

    x2d = features.reshape(N, H)
    if Np != N:
        x2d = jnp.pad(x2d, ((0, Np - N), (0, 0)))

    w1 = dense_w.T                                   # [H, H]  so kernel does x @ W^T
    wd = emb_weight
    bd = dec_b
    if Vp != V:
        wd = jnp.pad(wd, ((0, Vp - V), (0, 0)))
        bd = jnp.pad(bd, ((0, Vp - V),))
    wd = wd.T                                        # [H, Vp]
    bd = bd.reshape(1, Vp)
    g = ln_gamma.reshape(1, H)
    beta = ln_beta.reshape(1, H)

    grid = (Np // tm, Vp // tn)

    in_arrays = [x2d, w1]
    in_specs = [
        pl.BlockSpec((tm, H), lambda i, j: (i, 0)),      # features tile
        pl.BlockSpec((H, H), lambda i, j: (0, 0)),       # dense weight (resident)
    ]
    if add_bias:
        in_arrays.append(dense_b.reshape(1, H))
        in_specs.append(pl.BlockSpec((1, H), lambda i, j: (0, 0)))   # dense bias
    in_arrays += [g, beta, wd, bd]
    in_specs += [
        pl.BlockSpec((1, H), lambda i, j: (0, 0)),       # LN gamma
        pl.BlockSpec((1, H), lambda i, j: (0, 0)),       # LN beta
        pl.BlockSpec((H, tn), lambda i, j: (0, j)),      # decoder weight vocab tile
        pl.BlockSpec((1, tn), lambda i, j: (0, j)),      # decoder bias vocab tile
    ]

    kernel = functools.partial(_lm_head_kernel, eps=eps, add_bias=add_bias)

    itemsize = jnp.dtype(features.dtype).itemsize
    cost = pl.CostEstimate(
        flops=int(2 * Np * H * (H + Vp)),
        transcendentals=0,
        bytes_accessed=int(x2d.size * itemsize
                           + w1.size * jnp.dtype(w1.dtype).itemsize
                           + (Np // tm) * wd.size * jnp.dtype(wd.dtype).itemsize
                           + Np * Vp * itemsize),
    )

    out = pl.pallas_call(
        kernel,
        out_shape=jax.ShapeDtypeStruct((Np, Vp), features.dtype),
        grid_spec=pltpu.PrefetchScalarGridSpec(
            num_scalar_prefetch=0,
            grid=grid,
            in_specs=in_specs,
            out_specs=pl.BlockSpec((tm, tn), lambda i, j: (i, j)),
            scratch_shapes=[pltpu.VMEM((tm, H), features.dtype)],   # h, reused over V tiles
        ),
        compiler_params=pltpu.CompilerParams(
            dimension_semantics=("parallel", "arbitrary"),
            vmem_limit_bytes=vmem_limit_bytes,
        ),
        cost_estimate=cost,
    )(*in_arrays)

    return out[:N, :V].reshape(B, S, V)


def _xavier_uniform(key, shape, dtype=jnp.float32):
    # matches torch.nn.init.xavier_uniform_ for a 2-D weight [fan_out, fan_in]
    fan_out, fan_in = shape
    limit = (6.0 / (fan_in + fan_out)) ** 0.5
    return jax.random.uniform(key, shape, dtype, minval=-limit, maxval=limit)


def _reference(features, dense_w, dense_b, ln_gamma, ln_beta, emb_weight, dec_b,
               eps=1e-5, add_bias=True):
    x = features.astype(jnp.float32)
    h = x @ dense_w.T.astype(jnp.float32)
    if add_bias:
        h = h + dense_b
    h = jnp.maximum(h, 0.0)
    mu = jnp.mean(h, axis=-1, keepdims=True)
    var = jnp.mean((h - mu) ** 2, axis=-1, keepdims=True)
    h = (h - mu) / jnp.sqrt(var + eps)
    h = h * ln_gamma + ln_beta
    return h @ emb_weight.T.astype(jnp.float32) + dec_b


if __name__ == "__main__":
    B, S, H, V = 2, 8, 32, 64
    add_bias = True
    eps = 1e-5

    key = jax.random.PRNGKey(0)
    k_feat, k_dense, k_emb = jax.random.split(key, 3)

    features = jax.random.normal(k_feat, (B, S, H), dtype=jnp.float32)

    # Deterministic parameter init mirroring MultiSourceLMHead.init():
    #   xavier_uniform for 2-D weights, zeros for biases; LayerNorm gamma=1, beta=0.
    dense_w = _xavier_uniform(k_dense, (H, H))          # [out, in]
    dense_b = jnp.zeros((H,), jnp.float32)
    ln_gamma = jnp.ones((H,), jnp.float32)
    ln_beta = jnp.zeros((H,), jnp.float32)
    emb_weight = _xavier_uniform(k_emb, (V, H))         # embedding table, tied decoder weight
    dec_b = jnp.zeros((V,), jnp.float32)

    out = multi_source_lm_head(features, dense_w, dense_b, ln_gamma, ln_beta,
                               emb_weight, dec_b, eps=eps, add_bias=add_bias)
    out = jax.block_until_ready(out)

    ref = _reference(features, dense_w, dense_b, ln_gamma, ln_beta,
                     emb_weight, dec_b, eps=eps, add_bias=add_bias)

    assert out.shape == (B, S, V), out.shape
    assert jnp.allclose(out, ref, atol=1e-4, rtol=1e-4), \
        float(jnp.max(jnp.abs(out - ref)))

    print("KERNEL_OK")
</pallas_src>

<mosaic_0001>
module attributes {stable_mosaic.version = 11 : i64} {
  func.func @_lm_head_kernel(%arg0: i32, %arg1: i32, %arg2: memref<16x32xf32, #tpu.memory_space<vmem>>, %arg3: memref<32x32xf32, #tpu.memory_space<vmem>>, %arg4: memref<1x32xf32, #tpu.memory_space<vmem>>, %arg5: memref<1x32xf32, #tpu.memory_space<vmem>>, %arg6: memref<1x32xf32, #tpu.memory_space<vmem>>, %arg7: memref<32x128xf32, #tpu.memory_space<vmem>>, %arg8: memref<1x128xf32, #tpu.memory_space<vmem>>, %arg9: memref<16x128xf32, #tpu.memory_space<vmem>>, %arg10: memref<16x32xf32, #tpu.memory_space<vmem>>) attributes {dimension_semantics = [#tpu.dimension_semantics<parallel>, #tpu.dimension_semantics<arbitrary>], iteration_bounds = array<i64: 1, 1>, scalar_prefetch = 0 : i64, scratch_operands = 1 : i64, tpu.core_type = #tpu.core_type<tc>, window_params = [{transform_indices = @transform_0, window_bounds = array<i64: 16, 32>}, {pipeline_mode = #tpu.pipeline_mode<synchronous>, transform_indices = @transform_1, window_bounds = array<i64: 32, 32>}, {pipeline_mode = #tpu.pipeline_mode<synchronous>, transform_indices = @transform_2, window_bounds = array<i64: 1, 32>}, {pipeline_mode = #tpu.pipeline_mode<synchronous>, transform_indices = @transform_3, window_bounds = array<i64: 1, 32>}, {pipeline_mode = #tpu.pipeline_mode<synchronous>, transform_indices = @transform_4, window_bounds = array<i64: 1, 32>}, {transform_indices = @transform_5, window_bounds = array<i64: 32, 128>}, {transform_indices = @transform_6, window_bounds = array<i64: 1, 128>}, {transform_indices = @transform_7, window_bounds = array<i64: 16, 128>}]} {
    %c0_i32 = arith.constant 0 : i32
    %0 = arith.cmpi eq, %arg1, %c0_i32 : i32
    %1 = arith.extui %0 : i1 to i32
    %c0_i32_0 = arith.constant 0 : i32
    %2 = arith.cmpi ne, %1, %c0_i32_0 : i32
    scf.if %2 {
      %c0_8 = arith.constant 0 : index
      %c0_9 = arith.constant 0 : index
      %10 = vector.load %arg2[%c0_8, %c0_9] : memref<16x32xf32, #tpu.memory_space<vmem>>, vector<16x32xf32>
      %c0_10 = arith.constant 0 : index
      %c0_11 = arith.constant 0 : index
      %11 = vector.load %arg3[%c0_10, %c0_11] : memref<32x32xf32, #tpu.memory_space<vmem>>, vector<32x32xf32>
      %cst_12 = arith.constant dense<0.000000e+00> : vector<16x32xf32>
      %12 = tpu.matmul %10, %11, %cst_12 {dimension_numbers = #tpu.dot_dimension_numbers<[1], [0], [0], [1], [0, 0, 1, 1], [], []>} : vector<16x32xf32>, vector<32x32xf32>, vector<16x32xf32> -> vector<16x32xf32>
      %c0_13 = arith.constant 0 : index
      %c0_14 = arith.constant 0 : index
      %13 = vector.load %arg4[%c0_13, %c0_14] : memref<1x32xf32, #tpu.memory_space<vmem>>, vector<1x32xf32>
      %14 = vector.broadcast %13 : vector<1x32xf32> to vector<16x32xf32>
      %15 = arith.addf %12, %14 : vector<16x32xf32>
      %cst_15 = arith.constant 0.000000e+00 : f32
      %16 = vector.broadcast %cst_15 : f32 to vector<16x32xf32>
      %17 = arith.maximumf %15, %16 : vector<16x32xf32>
      %cst_16 = arith.constant dense<0.000000e+00> : vector<16xf32>
      %18 = vector.multi_reduction <add>, %17, %cst_16 [1] : vector<16x32xf32> to vector<16xf32>
      %19 = vector.shape_cast %18 : vector<16xf32> to vector<16x1xf32>
      %cst_17 = arith.constant 3.200000e+01 : f32
      %20 = vector.broadcast %cst_17 : f32 to vector<16x1xf32>
      %21 = arith.divf %19, %20 : vector<16x1xf32>
      %22 = vector.broadcast %21 : vector<16x1xf32> to vector<16x32xf32>
      %23 = arith.subf %17, %22 : vector<16x32xf32>
      %24 = vector.broadcast %21 : vector<16x1xf32> to vector<16x32xf32>
      %25 = arith.subf %17, %24 : vector<16x32xf32>
      %26 = arith.mulf %23, %25 : vector<16x32xf32>
      %cst_18 = arith.constant dense<0.000000e+00> : vector<16xf32>
      %27 = vector.multi_reduction <add>, %26, %cst_18 [1] : vector<16x32xf32> to vector<16xf32>
      %28 = vector.shape_cast %27 : vector<16xf32> to vector<16x1xf32>
      %cst_19 = arith.constant 3.200000e+01 : f32
      %29 = vector.broadcast %cst_19 : f32 to vector<16x1xf32>
      %30 = arith.divf %28, %29 : vector<16x1xf32>
      %31 = vector.broadcast %21 : vector<16x1xf32> to vector<16x32xf32>
      %32 = arith.subf %17, %31 : vector<16x32xf32>
      %cst_20 = arith.constant 9.99999974E-6 : f32
      %33 = vector.broadcast %cst_20 : f32 to vector<16x1xf32>
      %34 = arith.addf %30, %33 : vector<16x1xf32>
      %35 = math.rsqrt %34 : vector<16x1xf32>
      %36 = vector.broadcast %35 : vector<16x1xf32> to vector<16x32xf32>
      %37 = arith.mulf %32, %36 : vector<16x32xf32>
      %c0_21 = arith.constant 0 : index
      %c0_22 = arith.constant 0 : index
      %38 = vector.load %arg5[%c0_21, %c0_22] : memref<1x32xf32, #tpu.memory_space<vmem>>, vector<1x32xf32>
      %39 = vector.broadcast %38 : vector<1x32xf32> to vector<16x32xf32>
      %40 = arith.mulf %37, %39 : vector<16x32xf32>
      %c0_23 = arith.constant 0 : index
      %c0_24 = arith.constant 0 : index
      %41 = vector.load %arg6[%c0_23, %c0_24] : memref<1x32xf32, #tpu.memory_space<vmem>>, vector<1x32xf32>
      %42 = vector.broadcast %41 : vector<1x32xf32> to vector<16x32xf32>
      %43 = arith.addf %40, %42 : vector<16x32xf32>
      %c0_25 = arith.constant 0 : index
      %c0_26 = arith.constant 0 : index
      %44 = vector.load %arg10[%c0_25, %c0_26] : memref<16x32xf32, #tpu.memory_space<vmem>>, vector<16x32xf32>
      tpu.vector_store %arg10[%c0_25, %c0_26], %43 {strides = array<i32>} : memref<16x32xf32, #tpu.memory_space<vmem>>, vector<16x32xf32>,
    } else {
    }
    %c0 = arith.constant 0 : index
    %c0_1 = arith.constant 0 : index
    %3 = vector.load %arg10[%c0, %c0_1] : memref<16x32xf32, #tpu.memory_space<vmem>>, vector<16x32xf32>
    %c0_2 = arith.constant 0 : index
    %c0_3 = arith.constant 0 : index
    %4 = vector.load %arg7[%c0_2, %c0_3] : memref<32x128xf32, #tpu.memory_space<vmem>>, vector<32x128xf32>
    %cst = arith.constant dense<0.000000e+00> : vector<16x128xf32>
    %5 = tpu.matmul %3, %4, %cst {dimension_numbers = #tpu.dot_dimension_numbers<[1], [0], [0], [1], [0, 0, 1, 1], [], []>} : vector<16x32xf32>, vector<32x128xf32>, vector<16x128xf32> -> vector<16x128xf32>
    %c0_4 = arith.constant 0 : index
    %c0_5 = arith.constant 0 : index
    %6 = vector.load %arg8[%c0_4, %c0_5] : memref<1x128xf32, #tpu.memory_space<vmem>>, vector<1x128xf32>
    %7 = vector.broadcast %6 : vector<1x128xf32> to vector<16x128xf32>
    %8 = arith.addf %5, %7 : vector<16x128xf32>
    %c0_6 = arith.constant 0 : index
    %c0_7 = arith.constant 0 : index
    %9 = vector.load %arg9[%c0_6, %c0_7] : memref<16x128xf32, #tpu.memory_space<vmem>>, vector<16x128xf32>
    tpu.vector_store %arg9[%c0_6, %c0_7], %8 {strides = array<i32>} : memref<16x128xf32, #tpu.memory_space<vmem>>, vector<16x128xf32>,
    return
  }
  func.func @transform_0(%arg0: i32, %arg1: i32) -> (i32, i32) {
    %c0_i32 = arith.constant 0 : i32
    %c0_i32_0 = arith.constant 0 : i32
    return %arg0, %c0_i32 : i32, i32
  }
  func.func @transform_1(%arg0: i32, %arg1: i32) -> (i32, i32) {
    %c0_i32 = arith.constant 0 : i32
    %c0_i32_0 = arith.constant 0 : i32
    %c0_i32_1 = arith.constant 0 : i32
    return %c0_i32, %c0_i32_0 : i32, i32
  }
  func.func @transform_2(%arg0: i32, %arg1: i32) -> (i32, i32) {
    %c0_i32 = arith.constant 0 : i32
    %c0_i32_0 = arith.constant 0 : i32
    %c0_i32_1 = arith.constant 0 : i32
    return %c0_i32, %c0_i32_0 : i32, i32
  }
  func.func @transform_3(%arg0: i32, %arg1: i32) -> (i32, i32) {
    %c0_i32 = arith.constant 0 : i32
    %c0_i32_0 = arith.constant 0 : i32
    %c0_i32_1 = arith.constant 0 : i32
    return %c0_i32, %c0_i32_0 : i32, i32
  }
  func.func @transform_4(%arg0: i32, %arg1: i32) -> (i32, i32) {
    %c0_i32 = arith.constant 0 : i32
    %c0_i32_0 = arith.constant 0 : i32
    %c0_i32_1 = arith.constant 0 : i32
    return %c0_i32, %c0_i32_0 : i32, i32
  }
  func.func @transform_5(%arg0: i32, %arg1: i32) -> (i32, i32) {
    %c0_i32 = arith.constant 0 : i32
    %c0_i32_0 = arith.constant 0 : i32
    return %c0_i32, %arg1 : i32, i32
  }
  func.func @transform_6(%arg0: i32, %arg1: i32) -> (i32, i32) {
    %c0_i32 = arith.constant 0 : i32
    %c0_i32_0 = arith.constant 0 : i32
    return %c0_i32, %arg1 : i32, i32
  }
  func.func @transform_7(%arg0: i32, %arg1: i32) -> (i32, i32) {
    %c0_i32 = arith.constant 0 : i32
    return %arg0, %arg1 : i32, i32
  }
}

</mosaic_0001>

<bundles_post_ra>
// kernel: tpu_custom_call.1
= control target key start
LH: loop header
LB: loop body
LE: loop exit
PB: predicated region body
PF: predicated region fallthrough
CT: control target
= control target key end

     0   :  { %12 = vsyncpa [#allocation4], 0  ;;  %s820_s0 = inlined_call_operand.hbm [shape: f32[16,32], index: 0, kind: input, shape index: {}]   ;;  %s821_s1 = inlined_call_operand.hbm [shape: f32[32,32], index: 1, kind: input, shape index: {}]   ;;  %s822_s2 = inlined_call_operand.hbm [shape: f32[1,32], index: 2, kind: input, shape index: {}]   ;;  %s823_s3 = inlined_call_operand.hbm [shape: f32[1,32], index: 3, kind: input, shape index: {}]   ;;  %s824_s4 = inlined_call_operand.hbm [shape: f32[1,32], index: 4, kind: input, shape index: {}]   ;;  %s825_s5 = inlined_call_operand.hbm [shape: f32[32,128], index: 5, kind: input, shape index: {}]   ;;  %s826_s6 = inlined_call_operand.hbm [shape: f32[1,128], index: 6, kind: input, shape index: {}]   ;;  %s827_s7 = inlined_call_operand.hbm [shape: f32[16,128], index: 7, kind: output, shape index: {}]  }
   0x1   :  { %13 = vsyncpa [#allocation7], 0 }
   0x2   :  { %14 = vsyncpa [#allocation10], 0 }
   0x3   :  { %15 = vsyncpa [#allocation13], 0 }
   0x4   :  { %16 = vsyncpa [#allocation5], 0  ;;  %s637_s24 = smov [#allocation6]   ;;  %s638_s26 = smov [#allocation9]  }
   0x5   :  { %s34_s25 = sshll.u32 %s637_s24, 4  ;;  %s57_s27 = sshll.u32 %s638_s26, 4  ;;  %s35_s25 = int_to_ptr.vmem [resolvable:$true] %s34_s25  ;;  %s687_s27 = int_to_ptr.vmem [resolvable:$true] %s57_s27 }
   0x6   :  { %s451_s30 = scalar_lea.hbm %s821_s1, 512 }
   0x7   :  { %p452_p0 = scmp.ne.s32.totalorder %s821_s1, %s451_s30  ;;  %p455_p1 = scmp.lt.u32.totalorder %s451_s30, %s821_s1 }
   0x9   :  { %p457_p2 = pnand %p455_p1, %p452_p0 }
   0xb   :  { %460 = shalt.err (!%p457_p2)
}
   0xc   :  { %s461_s12 = scalar_lea.vmem %s35_s25, 512  ;;  %p466_p4 = scmp.lt.s32.totalorder %s35_s25, %s35_s25 }
   0xd   :  { %p462_p3 = scmp.ne.s32.totalorder %s35_s25, %s461_s12  ;;  %p467_p5 = scmp.lt.s32.totalorder %s461_s12, %s461_s12 }
   0xf   :  { %p468_p6 = por %p467_p5, %p466_p4 }
  0x11   :  { %p469_p7 = pnand %p468_p6, %p462_p3 }
  0x13   :  { %472 = shalt.err (!%p469_p7)
}
  0x14   :  { %s639_s13 = smov 128   ;;  %s640_s14 = smov 8  }
  0x15   :  { %40 = dma.hbm_to_vmem [thread:$0]  %s821_s1, 512, %s35_s25, [#allocation7], %s639_s13, %s639_s13, %s640_s14  }
  0x16   :  { %s473_s19 = scalar_lea.hbm %s823_s3, 16 }
  0x17   :  { %p474_p8 = scmp.ne.s32.totalorder %s823_s3, %s473_s19  ;;  %p477_p9 = scmp.lt.u32.totalorder %s473_s19, %s823_s3 }
  0x19   :  { %p479_p10 = pnand %p477_p9, %p474_p8 }
  0x1b   :  { %482 = shalt.err (!%p479_p10)
}
  0x1c   :  { %s483_s24 = scalar_lea.vmem %s687_s27, 16  ;;  %s487_s1 = scalar_lea.vmem %s687_s27, 32 }
  0x1d   :  { %p484_p11 = scmp.ne.s32.totalorder %s687_s27, %s483_s24  ;;  %p488_p12 = scmp.lt.s32.totalorder %s687_s27, %s687_s27 }
  0x1e   :  { %p489_p13 = scmp.lt.s32.totalorder %s487_s1, %s483_s24 }
  0x20   :  { %p490_p0 = por %p489_p13, %p488_p12 }
  0x22   :  { %p491_p1 = pnand %p490_p0, %p484_p11 }
  0x24   :  { %494 = shalt.err (!%p491_p1)
}
  0x25   :  { %60 = dma.hbm_to_vmem [thread:$0]  %s823_s3, 16, %s687_s27, [#allocation10]  }
  0x26   :  { %s641_s28 = smov [#allocation12]   ;;  %s642_s30 = smov [#allocation3]  }
  0x27   :  { %s76_s29 = sshll.u32 %s641_s28, 4  ;;  %s22_s8 = sshll.u32 %s642_s30, 4  ;;  %s77_s29 = int_to_ptr.vmem [resolvable:$true] %s76_s29  ;;  %s722_s8 = int_to_ptr.vmem [resolvable:$true] %s22_s8 }
  0x28   :  { %s495_s11 = scalar_lea.hbm %s825_s5, 512 }
  0x29   :  { %p496_p2 = scmp.ne.s32.totalorder %s825_s5, %s495_s11  ;;  %p499_p3 = scmp.lt.u32.totalorder %s495_s11, %s825_s5 }
  0x2b   :  { %p501_p4 = pnand %p499_p3, %p496_p2 }
  0x2d   :  { %504 = shalt.err (!%p501_p4)
}
  0x2e   :  { %s505_s3 = scalar_lea.vmem %s77_s29, 512  ;;  %p510_p6 = scmp.lt.s32.totalorder %s77_s29, %s77_s29 }
  0x2f   :  { %p506_p5 = scmp.ne.s32.totalorder %s77_s29, %s505_s3  ;;  %p511_p7 = scmp.lt.s32.totalorder %s505_s3, %s505_s3 }
  0x31   :  { %p512_p8 = por %p511_p7, %p510_p6 }
  0x33   :  { %p513_p9 = pnand %p512_p8, %p506_p5 }
  0x35   :  { %516 = shalt.err (!%p513_p9)
}
  0x36   :  { %82 = dma.hbm_to_vmem [thread:$0]  %s825_s5, 512, %s77_s29, [#allocation13], %s639_s13, %s639_s13, %s640_s14  }
  0x37   :  { %s517_s21 = scalar_lea.hbm %s820_s0, 256 }
  0x38   :  { %p518_p10 = scmp.ne.s32.totalorder %s820_s0, %s517_s21  ;;  %p521_p11 = scmp.lt.u32.totalorder %s517_s21, %s820_s0 }
  0x3a   :  { %p523_p12 = pnand %p521_p11, %p518_p10 }
  0x3c   :  { %526 = shalt.err (!%p523_p12)
}
  0x3d   :  { %s527_s25 = scalar_lea.vmem %s722_s8, 256  ;;  %p532_p0 = scmp.lt.s32.totalorder %s722_s8, %s722_s8 }
  0x3e   :  { %p528_p13 = scmp.ne.s32.totalorder %s722_s8, %s527_s25  ;;  %p533_p1 = scmp.lt.s32.totalorder %s527_s25, %s527_s25 }
  0x40   :  { %p534_p2 = por %p533_p1, %p532_p0 }
  0x42   :  { %p535_p3 = pnand %p534_p2, %p528_p13 }
  0x44   :  { %538 = shalt.err (!%p535_p3)
}
  0x45   :  { %28 = dma.hbm_to_vmem [thread:$0]  %s820_s0, 256, %s722_s8, [#allocation4], %s639_s13, %s639_s13, %s640_s14  }
  0x46   :  { %s643_s28 = smov [#allocation8]   ;;  %s644_s30 = smov [#allocation11]  }
  0x47   :  { %s47_s29 = sshll.u32 %s643_s28, 4  ;;  %s67_s9 = sshll.u32 %s644_s30, 4  ;;  %s48_s29 = int_to_ptr.vmem [resolvable:$true] %s47_s29  ;;  %s68_s9 = int_to_ptr.vmem [resolvable:$true] %s67_s9 }
  0x48   :  { %s539_s12 = scalar_lea.hbm %s822_s2, 16 }
  0x49   :  { %p540_p4 = scmp.ne.s32.totalorder %s822_s2, %s539_s12  ;;  %p543_p5 = scmp.lt.u32.totalorder %s539_s12, %s822_s2 }
  0x4b   :  { %p545_p6 = pnand %p543_p5, %p540_p4 }
  0x4d   :  { %548 = shalt.err (!%p545_p6)
}
  0x4e   :  { %s549_s0 = scalar_lea.vmem %s48_s29, 16  ;;  %s553_s8 = scalar_lea.vmem %s48_s29, 32 }
  0x4f   :  { %p550_p7 = scmp.ne.s32.totalorder %s48_s29, %s549_s0  ;;  %p554_p8 = scmp.lt.s32.totalorder %s48_s29, %s48_s29 }
  0x50   :  { %p555_p9 = scmp.lt.s32.totalorder %s553_s8, %s549_s0 }
  0x52   :  { %p556_p10 = por %p555_p9, %p554_p8 }
  0x54   :  { %p557_p11 = pnand %p556_p10, %p550_p7 }
  0x56   :  { %560 = shalt.err (!%p557_p11)
}
  0x57   :  { %50 = dma.hbm_to_vmem [thread:$0]  %s822_s2, 16, %s48_s29, [#allocation7]  }
  0x58   :  { %s561_s21 = scalar_lea.hbm %s824_s4, 16 }
  0x59   :  { %p562_p12 = scmp.ne.s32.totalorder %s824_s4, %s561_s21  ;;  %p565_p13 = scmp.lt.u32.totalorder %s561_s21, %s824_s4 }
  0x5b   :  { %p567_p0 = pnand %p565_p13, %p562_p12 }
  0x5d   :  { %570 = shalt.err (!%p567_p0)
}
  0x5e   :  { %s571_s25 = scalar_lea.vmem %s68_s9, 16  ;;  %s575_s5 = scalar_lea.vmem %s68_s9, 32 }
  0x5f   :  { %p572_p1 = scmp.ne.s32.totalorder %s68_s9, %s571_s25  ;;  %p576_p2 = scmp.lt.s32.totalorder %s68_s9, %s68_s9 }
  0x60   :  { %p577_p3 = scmp.lt.s32.totalorder %s575_s5, %s571_s25 }
  0x62   :  { %p578_p4 = por %p577_p3, %p576_p2 }
  0x64   :  { %p579_p5 = pnand %p578_p4, %p572_p1 }
  0x66   :  { %582 = shalt.err (!%p579_p5)
}
  0x67   :  { %70 = dma.hbm_to_vmem [thread:$0]  %s824_s4, 16, %s68_s9, [#allocation10]  }
  0x68   :  { %s645_s28 = smov [#allocation14]   ;;  %s583_s11 = scalar_lea.hbm %s826_s6, 16 }
  0x69   :  { %s89_s29 = sshll.u32 %s645_s28, 4  ;;  %p584_p6 = scmp.ne.s32.totalorder %s826_s6, %s583_s11  ;;  %s90_s29 = int_to_ptr.vmem [resolvable:$true] %s89_s29 }
  0x6a   :  { %p587_p7 = scmp.lt.u32.totalorder %s583_s11, %s826_s6 }
  0x6c   :  { %p589_p8 = pnand %p587_p7, %p584_p6 }
  0x6e   :  { %592 = shalt.err (!%p589_p8)
}
  0x6f   :  { %s593_s3 = scalar_lea.vmem %s90_s29, 16  ;;  %s597_s4 = scalar_lea.vmem %s90_s29, 32 }
  0x70   :  { %p594_p9 = scmp.ne.s32.totalorder %s90_s29, %s593_s3  ;;  %p598_p10 = scmp.lt.s32.totalorder %s90_s29, %s90_s29 }
  0x71   :  { %p599_p11 = scmp.lt.s32.totalorder %s597_s4, %s593_s3 }
  0x73   :  { %p600_p12 = por %p599_p11, %p598_p10 }
  0x75   :  { %p601_p13 = pnand %p600_p12, %p594_p9 }
  0x77   :  { %604 = shalt.err (!%p601_p13)
}
  0x78   :  { %92 = dma.hbm_to_vmem [thread:$0]  %s826_s6, 16, %s90_s29, [#allocation13]  }
  0x79   :  { %627 = dma.done.wait [#allocation4], 256  }
  0x7a   :  { %628 = vsyncadd [#allocation4], 4294967040 }
  0x7b   :  { %629 = dma.done.wait [#allocation7], 528  }
  0x7c   :  { %630 = vsyncadd [#allocation7], 4294966768 }
  0x7d   :  { %631 = dma.done.wait [#allocation10], 32  }
  0x7e   :  { %632 = vsyncadd [#allocation10], 4294967264 }
  0x7f   :  { %633 = dma.done.wait [#allocation13], 528  }
  0x80   :  { %634 = vsyncadd [#allocation13], 4294966768  ;;  %vm131_vm0 = vcmask 261120   ;;  %v120_v0 = vld [vmem:[#allocation6] sm:$0xff]  ;;  %v121_v1 = vld [vmem:[#allocation6 + $0x8] sm:$0xff]  ;;  %s646_s6 = smov [#allocation15]  }
  0x81   :  { %v122_v2 = vld [vmem:[#allocation6 + $0x10] sm:$0xff]  ;;  %v421_v3 = vpack.c.bf16 %v121_v1, %v120_v0  ;;  %v123_v4 = vld [vmem:[#allocation6 + $0x18] sm:$0xff]  ;;  %v379_v8 = vld [vmem:[#allocation8] ss:$0 sm:$0xff]  ;;  %s364_s8 = sshll.u32 %s646_s6, 4  ;;  %s365_s8 = int_to_ptr.vmem [resolvable:$true] %s364_s8 }
  0x82   :  { %v118_v5 = vld [vmem:[#allocation3] sm:$0xff]  ;;  %v425_v6 = vpack.c.bf16 %v123_v4, %v122_v2  ;;  %v119_v7 = vld [vmem:[#allocation3 + $0x8] sm:$0xff]  ;;  %v264_v27 = vld [vmem:[#allocation12] sm:$0xff]  ;;  %s605_s27 = scalar_lea.vmem %s365_s8, 256  ;;  %p610_p1 = scmp.lt.s32.totalorder %s365_s8, %s365_s8 }
  0x83   :  { %407 = vmatprep.mubr.msk.f32.mxu0 %vm131_vm0, %v118_v5  ;;  %422 = vmatprep.subr.bf16.mxu0 %v421_v3  ;;  %v265_v28 = vld [vmem:[#allocation12 + $0x8] sm:$0xff]  ;;  %v266_v30 = vld [vmem:[#allocation12 + $0x10] sm:$0xff]  ;;  %v267_v31 = vld [vmem:[#allocation12 + $0x18] sm:$0xff]  ;;  %p606_p0 = scmp.ne.s32.totalorder %s365_s8, %s605_s27  ;;  %p611_p2 = scmp.lt.s32.totalorder %s605_s27, %s605_s27 }
  0x84   :  { %424 = vmatpush3.bf16.msra.mxu0 %v421_v3  ;;  %v429_v29 = vpack.c.bf16 %v265_v28, %v264_v27  ;;  %v433_v32 = vpack.c.bf16 %v267_v31, %v266_v30  ;;  %v382_v40 = vld [vmem:[#allocation9] ss:$0 sm:$0xff]  ;;  %v383_v42 = vld [vmem:[#allocation11] ss:$0 sm:$0xff]  ;;  %v384_v51 = vld [vmem:[#allocation14] ss:$0 sm:$0xff] }
  0x85   :  { %426 = vmatprep.subr.bf16.mxu0 %v425_v6  ;;  %p612_p3 = por %p611_p2, %p610_p1 }
  0x86   :  { %430 = vmatprep.subr.bf16.mxu1 %v429_v29 }
  0x87   :  { %432 = vmatpush3.bf16.msra.mxu1 %v429_v29  ;;  %p613_p4 = pnand %p612_p3, %p606_p0 }
  0x88   :  { %428 = vmatpush3.bf16.msra.mxu0 %v425_v6  ;;  %434 = vmatprep.subr.bf16.mxu1 %v433_v32 }
  0x8b   :  { %408 = vmatmul.mubr.msk.f32.vlgmr.msra.gmra.mrb[0].mxu0 %vm131_vm0, %v119_v7  ;;  %436 = vmatpush3.bf16.msra.mxu1 %v433_v32 }
 0x15e   :  { %v409_v9 = vpop.f32.mrb[0].mxu0 }
 0x15f   :  { %v204_v10 = vpop.f32.mrb[1].mxu0  ;;  %v210_v11 = vadd.f32 %v409_v9, %v379_v8 }
 0x160   :  { %v205_v12 = vadd.f32 %v379_v8, %v204_v10 }
 0x161   :  { %v214_v14 = vmax.f32 %v210_v11, 0.0 }
 0x162   :  { %v213_v13 = vmax.f32 %v205_v12, 0.0 }
 0x163   :  { %v218_v16 = vsel %vm131_vm0, %v214_v14, 0.0 }
 0x164   :  { %v215_v15 = vsel %vm131_vm0, %v213_v13, 0.0 }
 0x165   :  { %216 = vadd.xlane.f32.xlu0 %v215_v15 }
 0x169   :  { %219 = vadd.xlane.f32.xlu0 %v218_v16 }
 0x1f2   :  { %v217_v17 = vpop.xlane.xlu0 %216 }
 0x1f3   :  { %v222_v18 = vmul.f32 0.03125, %v217_v17 }
 0x1f5   :  { %v224_v19 = vsub.f32 %v213_v13, %v222_v18 }
 0x1f6   :  { %v220_v20 = vpop.xlane.xlu0 %219 }
 0x1f7   :  { %v223_v21 = vmul.f32 0.03125, %v220_v20  ;;  %v226_v22 = vmul.f32 %v224_v19, %v224_v19 }
 0x1f9   :  { %v225_v23 = vsub.f32 %v214_v14, %v223_v21  ;;  %v228_v24 = vsel %vm131_vm0, %v226_v22, 0.0 }
 0x1fa   :  { %229 = vadd.xlane.f32.xlu1 %v228_v24 }
 0x1fb   :  { %v227_v25 = vmul.f32 %v225_v23, %v225_v23 }
 0x1fd   :  { %v231_v26 = vsel %vm131_vm0, %v227_v25, 0.0 }
 0x1fe   :  { %232 = vadd.xlane.f32.xlu1 %v231_v26 }
 0x287   :  { %v230_v33 = vpop.xlane.xlu1 %229 }
 0x288   :  { %v234_v34 = vmul.f32 0.03125, %v230_v33 }
 0x28a   :  { %v236_v35 = vadd.f32 1e-05, %v234_v34 }
 0x28b   :  { %v233_v36 = vpop.xlane.xlu1 %232 }
 0x28c   :  { %447 = vrsqrt.f32 %v236_v35  ;;  %v235_v37 = vmul.f32 0.03125, %v233_v36 }
 0x28e   :  { %v237_v38 = vadd.f32 1e-05, %v235_v37 }
 0x290   :  { %449 = vrsqrt.f32 %v237_v38 }
 0x296   :  { %v448_v39 = vpop.eup %447 }
 0x297   :  { %v240_v41 = vmul.f32 %v448_v39, %v224_v19 }
 0x299   :  { %v249_v43 = vmul.f32 %v382_v40, %v240_v41 }
 0x29a   :  { %v450_v44 = vpop.eup %449 }
 0x29b   :  { %v258_v45 = vadd.f32 %v383_v42, %v249_v43  ;;  %v241_v46 = vmul.f32 %v450_v44, %v225_v23 }
 0x29d   :  { %260 = vst.msk [vmem:[#allocation2] sm:$0xff] %vm131_vm0, %v258_v45  ;;  %v250_v47 = vmul.f32 %v382_v40, %v241_v46 }
 0x29f   :  { %v259_v48 = vadd.f32 %v383_v42, %v250_v47 }
 0x2a1   :  { %261 = vst.msk [vmem:[#allocation2 + $0x8] sm:$0xff] %vm131_vm0, %v259_v48 }
 0x2a4   :  { %v262_v49 = vld [vmem:[#allocation2] sm:$0xff] }
 0x2a5   :  { %418 = vmatprep.mubr.msk.f32.mxu1 %vm131_vm0, %v262_v49 }
 0x2a8   :  { %v263_v50 = vld [vmem:[#allocation2 + $0x8] sm:$0xff] }
 0x2a9   :  { %419 = vmatmul.mubr.msk.f32.vlgmr.msra.gmra.mrb[0].mxu1 %vm131_vm0, %v263_v50 }
 0x37c   :  { %v420_v52 = vpop.f32.mrb[0].mxu1 }
 0x37d   :  { %v354_v53 = vadd.f32 %v420_v52, %v384_v51  ;;  %v348_v54 = vpop.f32.mrb[1].mxu1 }
 0x37e   :  { %v349_v55 = vadd.f32 %v384_v51, %v348_v54 }
 0x37f   :  { %358 = vst [vmem:[#allocation15 + $0x8] sm:$0xff] %v354_v53 }
 0x380   :  { %357 = vst [vmem:[#allocation15] sm:$0xff] %v349_v55 }
 0x381   :  { %616 = shalt.err (!%p613_p4)
}
 0x382   :  { %s617_s20 = scalar_lea.hbm %s827_s7, 256 }
 0x383   :  { %p618_p5 = scmp.ne.s32.totalorder %s827_s7, %s617_s20  ;;  %p621_p6 = scmp.lt.u32.totalorder %s617_s20, %s827_s7 }
 0x385   :  { %p623_p7 = pnand %p621_p6, %p618_p5 }
 0x387   :  { %626 = shalt.err (!%p623_p7)
}
 0x388   :  { %370 = dma.vmem_to_hbm [thread:$0]  %s365_s8, 256, %s827_s7, [#allocation5], %s639_s13, %s639_s13, %s640_s14  }
 0x389   :  { %635 = dma.done.wait [#allocation5], 256  }
 0x38a   :  { %636 = vsyncadd [#allocation5], 4294967040 }
 0x38b   :  { %374 = vsyncpa [#allocation4], 1 }
 0x38c   :  { %375 = vsyncpa [#allocation7], 1 }
 0x38d   :  { %376 = vsyncpa [#allocation10], 1 }
 0x38e   :  { %377 = vsyncpa [#allocation13], 1 }
 0x38f   :  { %378 = vsyncpa [#allocation5], 1 }

</bundles_post_ra>
